<compile_context>
chip_gen: v7x
topology: tpu7x:2x2x1
jax: 0.10.0
libtpu: 0.0.40
codegen_flags: <defaults>
</compile_context>

<pallas_src>
import functools

import jax
import jax.numpy as jnp
from jax.experimental import pallas as pl
from jax.experimental.pallas import tpu as pltpu

# Config (deterministic, matches module defaults)
TARGET_VOLTAGE = 0.2          # config['resting_potential'] default
HOMEO_STRENGTH = 0.1          # config['homeostasis_strength'] default
ION_RANGES = {                # insertion order = sodium, potassium, calcium
    "sodium":    (0.05, 0.15),
    "potassium": (0.85, 0.95),
    "calcium":   (0.15, 0.25),
}


def _homeostasis_kernel(v_ref, na_ref, k_ref, ca_ref,
                        w1_ref, b1_ref, w2_ref, b2_ref,
                        v_out, na_out, k_out, ca_out):
    v = v_ref[...]
    na = na_ref[...]
    kk = k_ref[...]
    ca = ca_ref[...]

    voltage_error = TARGET_VOLTAGE - v

    def ion_error(grad, lo, hi):
        mid = (lo + hi) * 0.5
        err = mid - grad
        outside = jnp.logical_or(grad < lo, grad > hi)
        # single vsel instead of bool->f32 convert + add + mul
        return jnp.where(outside, 2.0 * err, err)

    combined = voltage_error
    combined = combined + ion_error(na, *ION_RANGES["sodium"]) * 0.2
    combined = combined + ion_error(kk, *ION_RANGES["potassium"]) * 0.2
    combined = combined + ion_error(ca, *ION_RANGES["calcium"]) * 0.2

    # homeostasis_network: Linear -> Sigmoid -> Linear, all in f32.
    # The MXU is idle relative to the state DMAs, so full-precision matmuls and
    # an exact sigmoid are free; bf16/approx tricks only cost accuracy here.
    h = jnp.dot(combined, w1_ref[...], preferred_element_type=jnp.float32) + b1_ref[...]
    sig = 1.0 / (1.0 + jnp.exp(-h))          # exp on the EUP slot; exact divide
    correction = jnp.dot(sig, w2_ref[...], preferred_element_type=jnp.float32) + b2_ref[...]

    corr_v = correction * HOMEO_STRENGTH
    corr_ion = correction * (HOMEO_STRENGTH * 0.5)
    v_out[...] = v + corr_v
    na_out[...] = na + corr_ion
    k_out[...] = kk + corr_ion
    ca_out[...] = ca + corr_ion


def _pick_tile_b(B, D, requested):
    """Pick a batch tile: as large as VMEM comfortably allows, sublane-aligned."""
    # VMEM per grid step = 8 state tiles (4 in + 4 out) x 2 pipeline buffers
    #                    x tile_b*D*4 bytes, plus ~2*D*D*4 of resident weights.
    # Cap the state footprint at ~12 MiB so it fits the smallest default scoped
    # VMEM limit (v5e: 16 MiB; v6e/v7x: 32 MiB) with headroom, no limit override.
    vmem_budget = 12 * 1024 * 1024
    cap = vmem_budget // (8 * 2 * D * 4)
    cap = max(8, (cap // 8) * 8)
    tile_b = max(8, min(requested, cap, B))
    if tile_b < B:
        tile_b = max(8, (tile_b // 8) * 8)      # keep sublane alignment for tiling
    # Prefer >=2 grid steps so the auto-pipeline actually overlaps DMA with compute
    # (on v7x the grid is also sharded across 2 TCs; a 1-step grid degenerates).
    if B // tile_b < 2 and B >= 16:
        tile_b = max(8, ((B + 1) // 2 // 8) * 8)
    return tile_b


@functools.partial(jax.jit, static_argnames=("tile_b",), donate_argnums=(0, 1, 2, 3))
def homeostasis_forward(voltage, na, k, ca, w1_t, b1, w2_t, b2, *, tile_b=1024):
    """voltage/na/k/ca: (B, D) f32; w*_t: (D, D) pre-transposed; b*: (1, D).

    NOTE: the four state arrays are donated and overwritten in-place
    (input_output_aliases); callers must not reuse them after the call.
    """
    B, D = voltage.shape
    tile_b = _pick_tile_b(B, D, tile_b)
    grid = (pl.cdiv(B, tile_b),)   # partial last block is masked by Pallas

    state_spec = pl.BlockSpec((tile_b, D), lambda i: (i, 0))
    # Constant index_map -> weights/biases DMA'd once, VMEM-resident across the grid.
    # (pipeline_mode=pl.Buffered(1) would shave ~100 KiB more; skipped — not needed
    #  under the 12 MiB state budget above.)
    w_spec = pl.BlockSpec((D, D), lambda i: (0, 0))
    b_spec = pl.BlockSpec((1, D), lambda i: (0, 0))
    out_sd = jax.ShapeDtypeStruct((B, D), jnp.float32)

    cost = pl.CostEstimate(
        flops=4 * B * D * D,                                   # two (B,D)x(D,D) matmuls
        transcendentals=B * D,                                 # exp in sigmoid
        bytes_accessed=8 * B * D * 4 + 2 * D * D * 4 + 2 * D * 4,
    )

    # TODO(synk): if the caller can hold state as one (B, 4*D) slab (or a bf16
    # state dtype), a single input/output BlockSpec would cut 8 DMAs/step to 2
    # and halve HBM bytes; requires a caller-side layout change.
    return pl.pallas_call(
        _homeostasis_kernel,
        grid=grid,
        in_specs=[state_spec, state_spec, state_spec, state_spec,
                  w_spec, b_spec, w_spec, b_spec],
        out_specs=(state_spec, state_spec, state_spec, state_spec),
        out_shape=(out_sd, out_sd, out_sd, out_sd),
        input_output_aliases={0: 0, 1: 1, 2: 2, 3: 3},
        compiler_params=pltpu.CompilerParams(
            dimension_semantics=("parallel",)),
        cost_estimate=cost,
    )(voltage, na, k, ca, w1_t, b1, w2_t, b2)


def _reference(voltage, na, k, ca, w1_t, b1, w2_t, b2):
    """Pure-JAX f32 reference matching the PyTorch module."""
    def ion_error(grad, lo, hi):
        mid = (lo + hi) * 0.5
        err = mid - grad
        outside = jnp.logical_or(grad < lo, grad > hi)
        return err * (1.0 + outside.astype(jnp.float32))

    combined = (TARGET_VOLTAGE - voltage)
    combined = combined + ion_error(na, *ION_RANGES["sodium"]) * 0.2
    combined = combined + ion_error(k,  *ION_RANGES["potassium"]) * 0.2
    combined = combined + ion_error(ca, *ION_RANGES["calcium"]) * 0.2
    h = 1.0 / (1.0 + jnp.exp(-(combined @ w1_t + b1)))
    corr = h @ w2_t + b2
    s = HOMEO_STRENGTH
    return (voltage + corr * s,
            na + corr * s * 0.5,
            k + corr * s * 0.5,
            ca + corr * s * 0.5)


if __name__ == "__main__":
    B, D = 64, 128        # small demo: batch 64, field_dimension 128 (lane-aligned)
    key = jax.random.PRNGKey(0)
    kv, kna, kk, kca, kw1, kb1, kw2, kb2 = jax.random.split(key, 8)

    voltage = jax.random.uniform(kv, (B, D), jnp.float32, -0.5, 0.5)
    na = jax.random.uniform(kna, (B, D), jnp.float32, 0.0, 0.3)
    k  = jax.random.uniform(kk,  (B, D), jnp.float32, 0.7, 1.0)
    ca = jax.random.uniform(kca, (B, D), jnp.float32, 0.0, 0.4)

    # Deterministic synthetic parameters for nn.Linear(D, D) x2 (pre-transposed (in, out))
    bound = 1.0 / jnp.sqrt(D)
    w1_t = jax.random.uniform(kw1, (D, D), jnp.float32, -bound, bound)
    b1   = jax.random.uniform(kb1, (1, D), jnp.float32, -bound, bound)
    w2_t = jax.random.uniform(kw2, (D, D), jnp.float32, -bound, bound)
    b2   = jax.random.uniform(kb2, (1, D), jnp.float32, -bound, bound)

    # Reference first: the state inputs are donated to the kernel call below.
    refs = jax.block_until_ready(_reference(voltage, na, k, ca, w1_t, b1, w2_t, b2))

    outs = homeostasis_forward(voltage, na, k, ca, w1_t, b1, w2_t, b2)
    outs = jax.block_until_ready(outs)

    # f32 path end-to-end; small slack only for MXU default-precision matmul passes
    # vs. the XLA reference matmul (corrections are further scaled by 0.1).
    for o, r in zip(outs, refs):
        assert jnp.allclose(o, r, atol=1e-3, rtol=1e-3), "mismatch vs reference"

    print("KERNEL_OK")
</pallas_src>

<mosaic_0001>
module attributes {stable_mosaic.version = 11 : i64} {
  func.func @_homeostasis_kernel(%arg0: i32, %arg1: memref<32x128xf32, #tpu.memory_space<vmem>>, %arg2: memref<32x128xf32, #tpu.memory_space<vmem>>, %arg3: memref<32x128xf32, #tpu.memory_space<vmem>>, %arg4: memref<32x128xf32, #tpu.memory_space<vmem>>, %arg5: memref<128x128xf32, #tpu.memory_space<vmem>>, %arg6: memref<1x128xf32, #tpu.memory_space<vmem>>, %arg7: memref<128x128xf32, #tpu.memory_space<vmem>>, %arg8: memref<1x128xf32, #tpu.memory_space<vmem>>, %arg9: memref<32x128xf32, #tpu.memory_space<vmem>>, %arg10: memref<32x128xf32, #tpu.memory_space<vmem>>, %arg11: memref<32x128xf32, #tpu.memory_space<vmem>>, %arg12: memref<32x128xf32, #tpu.memory_space<vmem>>) attributes {dimension_semantics = [#tpu.dimension_semantics<parallel>], iteration_bounds = array<i64: 2>, scalar_prefetch = 0 : i64, scratch_operands = 0 : i64, tpu.core_type = #tpu.core_type<tc>, window_params = [{transform_indices = @transform_0, window_bounds = array<i64: 32, 128>}, {transform_indices = @transform_1, window_bounds = array<i64: 32, 128>}, {transform_indices = @transform_2, window_bounds = array<i64: 32, 128>}, {transform_indices = @transform_3, window_bounds = array<i64: 32, 128>}, {pipeline_mode = #tpu.pipeline_mode<synchronous>, transform_indices = @transform_4, window_bounds = array<i64: 128, 128>}, {pipeline_mode = #tpu.pipeline_mode<synchronous>, transform_indices = @transform_5, window_bounds = array<i64: 1, 128>}, {pipeline_mode = #tpu.pipeline_mode<synchronous>, transform_indices = @transform_6, window_bounds = array<i64: 128, 128>}, {pipeline_mode = #tpu.pipeline_mode<synchronous>, transform_indices = @transform_7, window_bounds = array<i64: 1, 128>}, {transform_indices = @transform_8, window_bounds = array<i64: 32, 128>}, {transform_indices = @transform_9, window_bounds = array<i64: 32, 128>}, {transform_indices = @transform_10, window_bounds = array<i64: 32, 128>}, {transform_indices = @transform_11, window_bounds = array<i64: 32, 128>}]} {
    %c0 = arith.constant 0 : index
    %c0_0 = arith.constant 0 : index
    %0 = vector.load %arg1[%c0, %c0_0] : memref<32x128xf32, #tpu.memory_space<vmem>>, vector<32x128xf32>
    %c0_1 = arith.constant 0 : index
    %c0_2 = arith.constant 0 : index
    %1 = vector.load %arg2[%c0_1, %c0_2] : memref<32x128xf32, #tpu.memory_space<vmem>>, vector<32x128xf32>
    %c0_3 = arith.constant 0 : index
    %c0_4 = arith.constant 0 : index
    %2 = vector.load %arg3[%c0_3, %c0_4] : memref<32x128xf32, #tpu.memory_space<vmem>>, vector<32x128xf32>
    %c0_5 = arith.constant 0 : index
    %c0_6 = arith.constant 0 : index
    %3 = vector.load %arg4[%c0_5, %c0_6] : memref<32x128xf32, #tpu.memory_space<vmem>>, vector<32x128xf32>
    %cst = arith.constant 2.000000e-01 : f32
    %4 = vector.broadcast %cst : f32 to vector<32x128xf32>
    %5 = arith.subf %4, %0 : vector<32x128xf32>
    %cst_7 = arith.constant 1.000000e-01 : f32
    %6 = vector.broadcast %cst_7 : f32 to vector<32x128xf32>
    %7 = arith.subf %6, %1 : vector<32x128xf32>
    %cst_8 = arith.constant 5.000000e-02 : f32
    %8 = vector.broadcast %cst_8 : f32 to vector<32x128xf32>
    %9 = arith.cmpf olt, %1, %8 : vector<32x128xf32>
    %cst_9 = arith.constant 1.500000e-01 : f32
    %10 = vector.broadcast %cst_9 : f32 to vector<32x128xf32>
    %11 = arith.cmpf ogt, %1, %10 : vector<32x128xf32>
    %12 = arith.ori %9, %11 : vector<32x128xi1>
    %cst_10 = arith.constant 2.000000e+00 : f32
    %13 = vector.broadcast %cst_10 : f32 to vector<32x128xf32>
    %14 = arith.mulf %13, %7 : vector<32x128xf32>
    %15 = arith.select %12, %14, %7 : vector<32x128xi1>, vector<32x128xf32>
    %cst_11 = arith.constant 2.000000e-01 : f32
    %16 = vector.broadcast %cst_11 : f32 to vector<32x128xf32>
    %17 = arith.mulf %15, %16 : vector<32x128xf32>
    %18 = arith.addf %5, %17 : vector<32x128xf32>
    %cst_12 = arith.constant 0.899999976 : f32
    %19 = vector.broadcast %cst_12 : f32 to vector<32x128xf32>
    %20 = arith.subf %19, %2 : vector<32x128xf32>
    %cst_13 = arith.constant 8.500000e-01 : f32
    %21 = vector.broadcast %cst_13 : f32 to vector<32x128xf32>
    %22 = arith.cmpf olt, %2, %21 : vector<32x128xf32>
    %cst_14 = arith.constant 0.949999988 : f32
    %23 = vector.broadcast %cst_14 : f32 to vector<32x128xf32>
    %24 = arith.cmpf ogt, %2, %23 : vector<32x128xf32>
    %25 = arith.ori %22, %24 : vector<32x128xi1>
    %cst_15 = arith.constant 2.000000e+00 : f32
    %26 = vector.broadcast %cst_15 : f32 to vector<32x128xf32>
    %27 = arith.mulf %26, %20 : vector<32x128xf32>
    %28 = arith.select %25, %27, %20 : vector<32x128xi1>, vector<32x128xf32>
    %cst_16 = arith.constant 2.000000e-01 : f32
    %29 = vector.broadcast %cst_16 : f32 to vector<32x128xf32>
    %30 = arith.mulf %28, %29 : vector<32x128xf32>
    %31 = arith.addf %18, %30 : vector<32x128xf32>
    %cst_17 = arith.constant 2.000000e-01 : f32
    %32 = vector.broadcast %cst_17 : f32 to vector<32x128xf32>
    %33 = arith.subf %32, %3 : vector<32x128xf32>
    %cst_18 = arith.constant 1.500000e-01 : f32
    %34 = vector.broadcast %cst_18 : f32 to vector<32x128xf32>
    %35 = arith.cmpf olt, %3, %34 : vector<32x128xf32>
    %cst_19 = arith.constant 2.500000e-01 : f32
    %36 = vector.broadcast %cst_19 : f32 to vector<32x128xf32>
    %37 = arith.cmpf ogt, %3, %36 : vector<32x128xf32>
    %38 = arith.ori %35, %37 : vector<32x128xi1>
    %cst_20 = arith.constant 2.000000e+00 : f32
    %39 = vector.broadcast %cst_20 : f32 to vector<32x128xf32>
    %40 = arith.mulf %39, %33 : vector<32x128xf32>
    %41 = arith.select %38, %40, %33 : vector<32x128xi1>, vector<32x128xf32>
    %cst_21 = arith.constant 2.000000e-01 : f32
    %42 = vector.broadcast %cst_21 : f32 to vector<32x128xf32>
    %43 = arith.mulf %41, %42 : vector<32x128xf32>
    %44 = arith.addf %31, %43 : vector<32x128xf32>
    %c0_22 = arith.constant 0 : index
    %c0_23 = arith.constant 0 : index
    %45 = vector.load %arg5[%c0_22, %c0_23] : memref<128x128xf32, #tpu.memory_space<vmem>>, vector<128x128xf32>
    %cst_24 = arith.constant dense<0.000000e+00> : vector<32x128xf32>
    %46 = tpu.matmul %44, %45, %cst_24 {dimension_numbers = #tpu.dot_dimension_numbers<[1], [0], [0], [1], [0, 0, 1, 1], [], []>} : vector<32x128xf32>, vector<128x128xf32>, vector<32x128xf32> -> vector<32x128xf32>
    %c0_25 = arith.constant 0 : index
    %c0_26 = arith.constant 0 : index
    %47 = vector.load %arg6[%c0_25, %c0_26] : memref<1x128xf32, #tpu.memory_space<vmem>>, vector<1x128xf32>
    %48 = vector.broadcast %47 : vector<1x128xf32> to vector<32x128xf32>
    %49 = arith.addf %46, %48 : vector<32x128xf32>
    %cst_27 = arith.constant 0.000000e+00 : f32
    %50 = vector.broadcast %cst_27 : f32 to vector<32x128xf32>
    %51 = arith.subf %50, %49 : vector<32x128xf32>
    %52 = math.exp %51 : vector<32x128xf32>
    %cst_28 = arith.constant 1.000000e+00 : f32
    %53 = vector.broadcast %cst_28 : f32 to vector<32x128xf32>
    %54 = arith.addf %53, %52 : vector<32x128xf32>
    %cst_29 = arith.constant 1.000000e+00 : f32
    %55 = vector.broadcast %cst_29 : f32 to vector<32x128xf32>
    %56 = arith.divf %55, %54 : vector<32x128xf32>
    %c0_30 = arith.constant 0 : index
    %c0_31 = arith.constant 0 : index
    %57 = vector.load %arg7[%c0_30, %c0_31] : memref<128x128xf32, #tpu.memory_space<vmem>>, vector<128x128xf32>
    %cst_32 = arith.constant dense<0.000000e+00> : vector<32x128xf32>
    %58 = tpu.matmul %56, %57, %cst_32 {dimension_numbers = #tpu.dot_dimension_numbers<[1], [0], [0], [1], [0, 0, 1, 1], [], []>} : vector<32x128xf32>, vector<128x128xf32>, vector<32x128xf32> -> vector<32x128xf32>
    %c0_33 = arith.constant 0 : index
    %c0_34 = arith.constant 0 : index
    %59 = vector.load %arg8[%c0_33, %c0_34] : memref<1x128xf32, #tpu.memory_space<vmem>>, vector<1x128xf32>
    %60 = vector.broadcast %59 : vector<1x128xf32> to vector<32x128xf32>
    %61 = arith.addf %58, %60 : vector<32x128xf32>
    %cst_35 = arith.constant 1.000000e-01 : f32
    %62 = vector.broadcast %cst_35 : f32 to vector<32x128xf32>
    %63 = arith.mulf %61, %62 : vector<32x128xf32>
    %cst_36 = arith.constant 5.000000e-02 : f32
    %64 = vector.broadcast %cst_36 : f32 to vector<32x128xf32>
    %65 = arith.mulf %61, %64 : vector<32x128xf32>
    %66 = arith.addf %0, %63 : vector<32x128xf32>
    %c0_37 = arith.constant 0 : index
    %c0_38 = arith.constant 0 : index
    %67 = vector.load %arg9[%c0_37, %c0_38] : memref<32x128xf32, #tpu.memory_space<vmem>>, vector<32x128xf32>
    tpu.vector_store %arg9[%c0_37, %c0_38], %66 {strides = array<i32>} : memref<32x128xf32, #tpu.memory_space<vmem>>, vector<32x128xf32>,
    %68 = arith.addf %1, %65 : vector<32x128xf32>
    %c0_39 = arith.constant 0 : index
    %c0_40 = arith.constant 0 : index
    %69 = vector.load %arg10[%c0_39, %c0_40] : memref<32x128xf32, #tpu.memory_space<vmem>>, vector<32x128xf32>
    tpu.vector_store %arg10[%c0_39, %c0_40], %68 {strides = array<i32>} : memref<32x128xf32, #tpu.memory_space<vmem>>, vector<32x128xf32>,
    %70 = arith.addf %2, %65 : vector<32x128xf32>
    %c0_41 = arith.constant 0 : index
    %c0_42 = arith.constant 0 : index
    %71 = vector.load %arg11[%c0_41, %c0_42] : memref<32x128xf32, #tpu.memory_space<vmem>>, vector<32x128xf32>
    tpu.vector_store %arg11[%c0_41, %c0_42], %70 {strides = array<i32>} : memref<32x128xf32, #tpu.memory_space<vmem>>, vector<32x128xf32>,
    %72 = arith.addf %3, %65 : vector<32x128xf32>
    %c0_43 = arith.constant 0 : index
    %c0_44 = arith.constant 0 : index
    %73 = vector.load %arg12[%c0_43, %c0_44] : memref<32x128xf32, #tpu.memory_space<vmem>>, vector<32x128xf32>
    tpu.vector_store %arg12[%c0_43, %c0_44], %72 {strides = array<i32>} : memref<32x128xf32, #tpu.memory_space<vmem>>, vector<32x128xf32>,
    return
  }
  func.func @transform_0(%arg0: i32) -> (i32, i32) {
    %c0_i32 = arith.constant 0 : i32
    %c0_i32_0 = arith.constant 0 : i32
    return %arg0, %c0_i32 : i32, i32
  }
  func.func @transform_1(%arg0: i32) -> (i32, i32) {
    %c0_i32 = arith.constant 0 : i32
    %c0_i32_0 = arith.constant 0 : i32
    return %arg0, %c0_i32 : i32, i32
  }
  func.func @transform_2(%arg0: i32) -> (i32, i32) {
    %c0_i32 = arith.constant 0 : i32
    %c0_i32_0 = arith.constant 0 : i32
    return %arg0, %c0_i32 : i32, i32
  }
  func.func @transform_3(%arg0: i32) -> (i32, i32) {
    %c0_i32 = arith.constant 0 : i32
    %c0_i32_0 = arith.constant 0 : i32
    return %arg0, %c0_i32 : i32, i32
  }
  func.func @transform_4(%arg0: i32) -> (i32, i32) {
    %c0_i32 = arith.constant 0 : i32
    %c0_i32_0 = arith.constant 0 : i32
    %c0_i32_1 = arith.constant 0 : i32
    return %c0_i32, %c0_i32_0 : i32, i32
  }
  func.func @transform_5(%arg0: i32) -> (i32, i32) {
    %c0_i32 = arith.constant 0 : i32
    %c0_i32_0 = arith.constant 0 : i32
    %c0_i32_1 = arith.constant 0 : i32
    return %c0_i32, %c0_i32_0 : i32, i32
  }
  func.func @transform_6(%arg0: i32) -> (i32, i32) {
    %c0_i32 = arith.constant 0 : i32
    %c0_i32_0 = arith.constant 0 : i32
    %c0_i32_1 = arith.constant 0 : i32
    return %c0_i32, %c0_i32_0 : i32, i32
  }
  func.func @transform_7(%arg0: i32) -> (i32, i32) {
    %c0_i32 = arith.constant 0 : i32
    %c0_i32_0 = arith.constant 0 : i32
    %c0_i32_1 = arith.constant 0 : i32
    return %c0_i32, %c0_i32_0 : i32, i32
  }
  func.func @transform_8(%arg0: i32) -> (i32, i32) {
    %c0_i32 = arith.constant 0 : i32
    %c0_i32_0 = arith.constant 0 : i32
    return %arg0, %c0_i32 : i32, i32
  }
  func.func @transform_9(%arg0: i32) -> (i32, i32) {
    %c0_i32 = arith.constant 0 : i32
    %c0_i32_0 = arith.constant 0 : i32
    return %arg0, %c0_i32 : i32, i32
  }
  func.func @transform_10(%arg0: i32) -> (i32, i32) {
    %c0_i32 = arith.constant 0 : i32
    %c0_i32_0 = arith.constant 0 : i32
    return %arg0, %c0_i32 : i32, i32
  }
  func.func @transform_11(%arg0: i32) -> (i32, i32) {
    %c0_i32 = arith.constant 0 : i32
    %c0_i32_0 = arith.constant 0 : i32
    return %arg0, %c0_i32 : i32, i32
  }
}

</mosaic_0001>

<bundles_post_ra>
// kernel: homeostasis_forward.1
= control target key start
LH: loop header
LB: loop body
LE: loop exit
PB: predicated region body
PF: predicated region fallthrough
CT: control target
= control target key end

     0   :  { %s2751_s0 = inlined_call_operand.hbm [shape: f32[64,128], index: 0, kind: input, shape index: {}, may-alias: {0,8}]   ;;  %s2752_s1 = inlined_call_operand.hbm [shape: f32[64,128], index: 1, kind: input, shape index: {}, may-alias: {1,9}]   ;;  %s2753_s2 = inlined_call_operand.hbm [shape: f32[64,128], index: 2, kind: input, shape index: {}, may-alias: {2,10}]   ;;  %s2754_s3 = inlined_call_operand.hbm [shape: f32[64,128], index: 3, kind: input, shape index: {}, may-alias: {3,11}]   ;;  %s2755_s4 = inlined_call_operand.hbm [shape: f32[128,128], index: 4, kind: input, shape index: {}]   ;;  %s2756_s5 = inlined_call_operand.vmem [shape: f32[1,128], index: 5, kind: input, shape index: {}]   ;;  %s2757_s6 = inlined_call_operand.hbm [shape: f32[128,128], index: 6, kind: input, shape index: {}]   ;;  %s2758_s7 = inlined_call_operand.vmem [shape: f32[1,128], index: 7, kind: input, shape index: {}]   ;;  %s2759_s8 = inlined_call_operand.hbm [shape: f32[64,128], index: 8, kind: output, shape index: {0}, may-alias: {0,8}]   ;;  %s2760_s9 = inlined_call_operand.hbm [shape: f32[64,128], index: 9, kind: output, shape index: {1}, may-alias: {1,9}]   ;;  %s2761_s10 = inlined_call_operand.hbm [shape: f32[64,128], index: 10, kind: output, shape index: {2}, may-alias: {2,10}]   ;;  %s2762_s11 = inlined_call_operand.hbm [shape: f32[64,128], index: 11, kind: output, shape index: {3}, may-alias: {3,11}]  }
   0x1   :  { %2791 = sst [smem:[#allocation32_spill]] %s2751_s0 }
   0x2   :  { %2792 = sst [smem:[#allocation33_spill]] %s2752_s1 }
   0x3   :  { %2793 = sst [smem:[#allocation34_spill]] %s2753_s2 }
   0x4   :  { %2794 = sst [smem:[#allocation35_spill]] %s2754_s3 }
   0x5   :  { %2795 = sst [smem:[#allocation36_spill]] %s2755_s4 }
   0x6   :  { %2796 = sst [smem:[#allocation37_spill]] %s2756_s5 }
   0x7   :  { %2797 = sst [smem:[#allocation38_spill]] %s2757_s6 }
   0x8   :  { %2798 = sst [smem:[#allocation39_spill]] %s2758_s7 }
   0x9   :  { %2799 = sst [smem:[#allocation40_spill]] %s2759_s8 }
   0xa   :  { %2800 = sst [smem:[#allocation41_spill]] %s2760_s9 }
   0xb   :  { %2801 = sst [smem:[#allocation42_spill]] %s2761_s10 }
   0xc   :  { %2802 = sst [smem:[#allocation43_spill]] %s2762_s11 }
   0xd   :  { %17 = vsyncpa [#allocation3], 0 }
   0xe   :  { %19 = vsyncpa [#allocation3 + $0x1], 0 }
   0xf   :  { %20 = vsyncpa [#allocation6], 0 }
  0x10   :  { %22 = vsyncpa [#allocation6 + $0x1], 0 }
  0x11   :  { %23 = vsyncpa [#allocation9], 0 }
  0x12   :  { %25 = vsyncpa [#allocation9 + $0x1], 0 }
  0x13   :  { %26 = vsyncpa [#allocation12], 0 }
  0x14   :  { %27 = vsyncpa [#allocation4], 0 }
  0x15   :  { %29 = vsyncpa [#allocation4 + $0x1], 0 }
  0x16   :  { %30 = vsyncpa [#allocation15], 0 }
  0x17   :  { %32 = vsyncpa [#allocation15 + $0x1], 0 }
  0x18   :  { %33 = vsyncpa [#allocation18], 0 }
  0x19   :  { %35 = vsyncpa [#allocation18 + $0x1], 0  ;;  %s2086_s17 = smov 0   ;;  %s2088_s18 = smov 0  }
  0x1a   :  { %s2090_s19 = smov 0   ;;  %s2092_s20 = smov 0  }
  0x1b LB: > { %2803 = sst [smem:[#allocation27_spill]] %s1998_s17  ;;  %s2107_s21 = sadd.s32 4294967295, %s2010_s20   ;;  %s2010_s20 = sphi %s2092_s20, %s2858_s20   ;;  %s2006_s19 = sphi %s2090_s19, %s2862_s19   ;;  %s2002_s18 = sphi %s2088_s18, %s2861_s18   ;;  %s1998_s17 = sphi %s2086_s17, %s2860_s17  }
  0x1c   : > { %s2763_s22 = sadd.s32 4294967294, %s2010_s20   ;;  %s2111_s23 = sadd.s32 1, %s2010_s20  }
  0x1d   : > { %2804 = sst [smem:[#allocation28_spill]] %s2111_s23  ;;  %s48_s24 = sadd.s32 1, %s2006_s19 }
  0x1e   : > { %s45_s25 = ssub.s32 %s2010_s20, %s2111_s23  ;;  %p55_p0 = scmp.ne.s32.totalorder %s2006_s19, %s2002_s18 }
  0x1f   : > { %p46_p1 = scmp.eq.s32.totalorder %s45_s25, 0  ;;  %p56_p2 = scmp.eq.s32.totalorder %s2010_s20, 0 }
  0x20   : > { %p61_p3 = scmp.ne.s32.totalorder %s2002_s18, %s1998_s17  ;;  %p2769_p4 = scmp.eq.s32.totalorder %s2107_s21, 0 }
  0x21   : > { %s2123_s26 = scalar_select %p46_p1, %s2006_s19, %s48_s24  }
  0x22   : > { %p2125_p5 = por %p56_p2, %p55_p0  ;;  %p2131_p6 = por %p2769_p4, %p61_p3 }
  0x23   : > { %2805 = sst [smem:[#allocation29_spill]] %s2123_s26  ;;  %p247_p7 = scmp.eq.s32.totalorder %s2107_s21, 1 }
  0x24   : > { %s2806_s27 = scalar_select %p2125_p5, 1, 0 }
  0x25   : > { %s2807_s28 = scalar_select %p2131_p6, 1, 0 }
  0x26   : > { %p253_p8 = scmp.eq.s32.totalorder %s2763_s22, 1  ;;  %p1312_p9 = scmp.ge.s32.totalorder %s2010_s20, 1 }
  0x27   : > { %p338_p10 = scmp.lt.s32.totalorder %s2010_s20, 3  ;;  %p2140_p11 = por %p247_p7, %p55_p0 }
  0x28   : > { %p2144_p12 = por %p253_p8, %p61_p3  ;;  %s2012_s13 = smov [#allocation10]  }
  0x29   : > { %s2808_s29 = scalar_select %p2140_p11, 1, 0 }
  0x2a   : > { %s2810_s30 = scalar_select %p2144_p12, 1, 0 }
  0x2b   : > { %2809 = sst [smem:[#allocation30_spill]] %s2808_s29  ;;  %p2148_p13 = pnand %p1312_p9, %p338_p10 }
  0x2c   : > { %2811 = sst [smem:[#allocation31_spill]] %s2810_s30  ;;  %s350_s14 = sshll.u32 %s2012_s13, 4  ;;  %s351_s14 = int_to_ptr.vmem [resolvable:$true] %s350_s14 }
  0x2d   : > { %s2812_s12 = scalar_select %p2148_p13, 1, 0 }
  0x2e   : > { %p1567_p1 = pneg %p2148_p13  ;;  %s2768_s16 = sand.u32 1, %s2006_s19  }
  0x2f   : > { %s2165_s24 = sshll.u32 %s2768_s16, 5  ;;  %s2814_s4 = sld [smem:[#allocation36_spill]] }
  0x30   : > { %p2156_p2 = pnand %p1567_p1, %p2769_p4 }
  0x32   : > { %s2813_s15 = scalar_select %p2156_p2, 1, 0 }
  0x33   : > { %p2780_p8 = pneg %p2156_p2 }
  0x35   : > { %s1660_s26 = scalar_lea.hbm %s2814_s4, 2048 }
  0x36   : > { %p1661_p7 = scmp.ne.s32.totalorder %s2814_s4, %s1660_s26  ;;  %p1667_p1 = scmp.lt.u32.totalorder %s1660_s26, %s2814_s4 }
  0x38   : > { %p1663_p9 = pnand %p2780_p8, %p1661_p7 }
  0x3a   : > { %p1664_p10 = pneg %p1663_p9 }
  0x3c   : > { %p1669_p0 = pnand %p1667_p1, %p1664_p10 }
  0x3e   : > { %1672 = shalt.err (!%p1669_p0)
}
  0x3f   : > { %s1673_s16 = scalar_lea.vmem %s351_s14, 2048  ;;  %p1681_p11 = scmp.lt.s32.totalorder %s351_s14, %s351_s14 }
  0x40   : > { %p1674_p4 = scmp.ne.s32.totalorder %s351_s14, %s1673_s16  ;;  %p1682_p6 = scmp.lt.s32.totalorder %s1673_s16, %s1673_s16 }
  0x42   : > { %p1676_p3 = pnand %p1674_p4, %p2780_p8  ;;  %p1683_p13 = por %p1682_p6, %p1681_p11 }
  0x44   : > { %p1677_p12 = pneg %p1676_p3 }
  0x46   : > { %p1684_p5 = pnand %p1683_p13, %p1677_p12 }
  0x48   : > { %1687 = shalt.err (!%p1684_p5)
}
  0x49   : > { %s2775_s22 = smov 128   ;;  %s2777_s17 = smov 8  }
  0x4a   : > { %1570 = dma.hbm_to_vmem [thread:$0]  (!%p2156_p2), %s2814_s4, 2048, %s351_s14, [#allocation9], %s2775_s22, %s2775_s22, %s2777_s17  }
  0x4b   : > { %s2193_s30 = sshll.u32 %s2010_s20, 9  ;;  %p2815_p4 = scmp.ne.s32.totalorder %s2806_s27, 0 }
  0x4c   : > { %p2816_p5 = scmp.lt.s32.totalorder %s2010_s20, 2  ;;  %s2779_s25 = sand.u32 1, %s2010_s20  }
  0x4d   : > { %s2818_s1 = sld [smem:[#allocation33_spill]]  ;;  %s408_s14 = scalar_lea.vmem [#allocation5], %s2165_s24 }
  0x4e   : > { %p2199_p6 = pnand %p2816_p5, %p2815_p4  ;;  %s415_s23 = sshll.u32 %s408_s14, 4  ;;  %s2211_s23 = int_to_ptr.vmem [resolvable:$true] %s415_s23 }
  0x4f   : > { %s2215_s27 = scalar_lea.sflag [#allocation6], %s2779_s25 }
  0x50   : > { %s2817_s16 = scalar_select %p2199_p6, 1, 0 }
  0x51   : > { %p2221_p12 = pneg %p2199_p6 }
  0x53   : > { %s2208_s10 = scalar_lea.hbm %s2818_s1, %s2193_s30  ;;  %s1693_s14 = scalar_lea.hbm %s2818_s1, 1024 }
  0x54   : > { %s1688_s26 = scalar_lea.hbm %s2208_s10, 512  ;;  %p1694_p3 = scmp.lt.u32.totalorder %s2208_s10, %s2818_s1 }
  0x55   : > { %p1689_p11 = scmp.ne.s32.totalorder %s2208_s10, %s1688_s26  ;;  %p1695_p7 = scmp.lt.u32.totalorder %s1693_s14, %s1688_s26 }
  0x56   : > { %s2819_s22 = scalar_select %p2221_p12, 1, 0 }
  0x57   : > { %p1691_p13 = pnand %p2221_p12, %p1689_p11  ;;  %p1696_p9 = por %p1695_p7, %p1694_p3 }
  0x58   : > { %p1697_p10 = scmp.lt.u32.totalorder %s1688_s26, %s2208_s10 }
  0x59   : > { %p1692_p0 = pneg %p1691_p13 }
  0x5a   : > { %p1698_p1 = por %p1697_p10, %p1696_p9 }
  0x5c   : > { %p1699_p4 = pnand %p1698_p1, %p1692_p0 }
  0x5e   : > { %1702 = shalt.err (!%p1699_p4)
}
  0x5f   : > { %s1703_s25 = scalar_lea.vmem %s2211_s23, 512  ;;  %s2015_s11 = smov [#allocation5]  }
  0x60   : > { %p1704_p5 = scmp.ne.s32.totalorder %s2211_s23, %s1703_s25  ;;  %s1708_s13 = sshll.u32 %s2015_s11, 4  ;;  %s1709_s13 = int_to_ptr.vmem [resolvable:$false] %s1708_s13 }
  0x61   : > { %s1710_s4 = scalar_lea.vmem %s1709_s13, 1024  ;;  %p1711_p8 = scmp.lt.s32.totalorder %s2211_s23, %s1709_s13 }
  0x62   : > { %p1706_p11 = pnand %p1704_p5, %p2221_p12  ;;  %p1712_p2 = scmp.lt.s32.totalorder %s1710_s4, %s1703_s25 }
  0x64   : > { %p1707_p13 = pneg %p1706_p11  ;;  %p1713_p3 = por %p1712_p2, %p1711_p8 }
  0x66   : > { %p1714_p7 = pnand %p1713_p3, %p1707_p13 }
  0x68   : > { %1717 = shalt.err (!%p1714_p7)
}
  0x69   : > { %s2820_s17 = smov 8   ;;  %s2821_s26 = smov 128  }
  0x6a   : > { %1580 = dma.hbm_to_vmem [thread:$0]  (!%p2199_p6), %s2208_s10, 512, %s2211_s23, %s2215_s27, %s2821_s26, %s2821_s26, %s2820_s17  }
  0x6b   : > { %s2016_s14 = smov [#allocation11]   ;;  %s2822_s0 = sld [smem:[#allocation32_spill]] }
  0x6c   : > { %s366_s11 = sshll.u32 %s2016_s14, 4  ;;  %s2823_s6 = sld [smem:[#allocation38_spill]]  ;;  %s367_s11 = int_to_ptr.vmem [resolvable:$true] %s366_s11 }
  0x6d   : > { %p2824_p8 = scmp.ne.s32.totalorder %s2813_s15, 0 }
  0x6f   : > { %p2825_p0 = pneg %p2824_p8 }
  0x71   : > { %s2252_s25 = scalar_lea.hbm %s2822_s0, %s2193_s30 }
  0x72   : > { %s1718_s29 = scalar_lea.hbm %s2823_s6, 2048 }
  0x73   : > { %p1719_p2 = scmp.ne.s32.totalorder %s2823_s6, %s1718_s29  ;;  %p1725_p1 = scmp.lt.u32.totalorder %s1718_s29, %s2823_s6 }
  0x75   : > { %p1721_p9 = pnand %p1719_p2, %p2825_p0 }
  0x77   : > { %p1722_p10 = pneg %p1721_p9 }
  0x79   : > { %p1727_p4 = pnand %p1725_p1, %p1722_p10 }
  0x7b   : > { %1730 = shalt.err (!%p1727_p4)
}
  0x7c   : > { %s1731_s1 = scalar_lea.vmem %s367_s11, 2048  ;;  %p2826_p11 = pmov %p2825_p0 }
  0x7d   : > { %p1732_p5 = scmp.ne.s32.totalorder %s367_s11, %s1731_s1  ;;  %p1739_p7 = scmp.lt.s32.totalorder %s367_s11, %s367_s11 }
  0x7e   : > { %p1740_p6 = scmp.lt.s32.totalorder %s1731_s1, %s1731_s1 }
  0x7f   : > { %p1734_p13 = pnand %p1732_p5, %p2826_p11 }
  0x80   : > { %p1741_p12 = por %p1740_p6, %p1739_p7 }
  0x81   : > { %p1735_p3 = pneg %p1734_p13 }
  0x83   : > { %p1742_p0 = pnand %p1741_p12, %p1735_p3 }
  0x85   : > { %1745 = shalt.err (!%p1742_p0)
}
  0x86   : > { %1573 = dma.hbm_to_vmem [thread:$0]  (!%p2824_p8), %s2823_s6, 2048, %s367_s11, [#allocation12], %s2821_s26, %s2821_s26, %s2820_s17  }
  0x87   : > { %s387_s9 = scalar_lea.vmem [#allocation2], %s2165_s24  ;;  %s2827_s2 = sld [smem:[#allocation34_spill]] }
  0x88   : > { %s394_s29 = sshll.u32 %s387_s9, 4  ;;  %s2828_s4 = sand.u32 1, %s2006_s19   ;;  %s2278_s29 = int_to_ptr.vmem [resolvable:$true] %s394_s29 }
  0x89   : > { %s2288_s10 = scalar_lea.sflag [#allocation3], %s2828_s4  ;;  %s1746_s23 = scalar_lea.hbm %s2252_s25, 512 }
  0x8a   : > { %p1747_p6 = scmp.ne.s32.totalorder %s2252_s25, %s1746_s23  ;;  %p2829_p12 = scmp.ne.s32.totalorder %s2819_s22, 0 }
  0x8b   : > { %s1751_s11 = scalar_lea.hbm %s2822_s0, 1024  ;;  %p1752_p8 = scmp.lt.u32.totalorder %s2252_s25, %s2822_s0 }
  0x8c   : > { %p1749_p2 = pnand %p1747_p6, %p2829_p12  ;;  %p1753_p10 = scmp.lt.u32.totalorder %s1751_s11, %s1746_s23 }
  0x8d   : > { %s2284_s13 = scalar_lea.hbm %s2827_s2, %s2193_s30  ;;  %p1755_p4 = scmp.lt.u32.totalorder %s1746_s23, %s2252_s25 }
  0x8e   : > { %p1750_p9 = pneg %p1749_p2  ;;  %p1754_p1 = por %p1753_p10, %p1752_p8 }
  0x90   : > { %p1756_p5 = por %p1755_p4, %p1754_p1 }
  0x92   : > { %p1757_p11 = pnand %p1756_p5, %p1750_p9 }
  0x94   : > { %1760 = shalt.err (!%p1757_p11)
}
  0x95   : > { %s1761_s15 = scalar_lea.vmem %s2278_s29, 512  ;;  %s2017_s14 = smov [#allocation2]  }
  0x96   : > { %p1762_p13 = scmp.ne.s32.totalorder %s2278_s29, %s1761_s15  ;;  %s1766_s4 = sshll.u32 %s2017_s14, 4  ;;  %s1767_s4 = int_to_ptr.vmem [resolvable:$false] %s1766_s4 }
  0x97   : > { %s1768_s1 = scalar_lea.vmem %s1767_s4, 1024  ;;  %p1769_p0 = scmp.lt.s32.totalorder %s2278_s29, %s1767_s4 }
  0x98   : > { %p1764_p3 = pnand %p1762_p13, %p2829_p12  ;;  %p1770_p6 = scmp.lt.s32.totalorder %s1768_s1, %s1761_s15 }
  0x9a   : > { %p1765_p7 = pneg %p1764_p3  ;;  %p1771_p2 = por %p1770_p6, %p1769_p0 }
  0x9c   : > { %p1772_p8 = pnand %p1771_p2, %p1765_p7 }
  0x9e   : > { %1775 = shalt.err (!%p1772_p8)
}
  0x9f   : > { %p2830_p9 = scmp.ne.s32.totalorder %s2817_s16, 0  ;;  %s429_s23 = scalar_lea.vmem [#allocation7], %s2165_s24 }
  0xa0   : > { %s436_s7 = sshll.u32 %s429_s23, 4  ;;  %s2831_s3 = sld [smem:[#allocation35_spill]]  ;;  %s2316_s7 = int_to_ptr.vmem [resolvable:$true] %s436_s7 }
  0xa1   : > { %1577 = dma.hbm_to_vmem [thread:$0]  (!%p2830_p9), %s2252_s25, 512, %s2278_s29, %s2288_s10, %s2821_s26, %s2821_s26, %s2820_s17  }
  0xa2   : > { %s1776_s15 = scalar_lea.hbm %s2284_s13, 512  ;;  %s1781_s1 = scalar_lea.hbm %s2827_s2, 1024 }
  0xa3   : > { %p1777_p10 = scmp.ne.s32.totalorder %s2284_s13, %s1776_s15  ;;  %p1782_p5 = scmp.lt.u32.totalorder %s2284_s13, %s2827_s2 }
  0xa4   : > { %p1783_p11 = scmp.lt.u32.totalorder %s1781_s1, %s1776_s15  ;;  %p1785_p3 = scmp.lt.u32.totalorder %s1776_s15, %s2284_s13 }
  0xa5   : > { %p1779_p1 = pnand %p1777_p10, %p2829_p12 }
  0xa6   : > { %s2322_s9 = scalar_lea.hbm %s2831_s3, %s2193_s30  ;;  %p1784_p13 = por %p1783_p11, %p1782_p5 }
  0xa7   : > { %p1780_p4 = pneg %p1779_p1 }
  0xa8   : > { %p1786_p7 = por %p1785_p3, %p1784_p13 }
  0xaa   : > { %p1787_p0 = pnand %p1786_p7, %p1780_p4 }
  0xac   : > { %1790 = shalt.err (!%p1787_p0)
}
  0xad   : > { %s1791_s30 = scalar_lea.vmem %s2316_s7, 512  ;;  %s2018_s29 = smov [#allocation7]  }
  0xae   : > { %p1792_p6 = scmp.ne.s32.totalorder %s2316_s7, %s1791_s30  ;;  %s1796_s10 = sshll.u32 %s2018_s29, 4  ;;  %s1797_s10 = int_to_ptr.vmem [resolvable:$false] %s1796_s10 }
  0xaf   : > { %s1798_s0 = scalar_lea.vmem %s1797_s10, 1024  ;;  %p1799_p10 = scmp.lt.s32.totalorder %s2316_s7, %s1797_s10 }
  0xb0   : > { %p1794_p2 = pnand %p1792_p6, %p2829_p12  ;;  %p1800_p1 = scmp.lt.s32.totalorder %s1798_s0, %s1791_s30 }
  0xb2   : > { %p1795_p8 = pneg %p1794_p2  ;;  %p1801_p5 = por %p1800_p1, %p1799_p10 }
  0xb4   : > { %p1802_p11 = pnand %p1801_p5, %p1795_p8 }
  0xb6   : > { %1805 = shalt.err (!%p1802_p11)
}
  0xb7   : > { %1583 = dma.hbm_to_vmem [thread:$0]  (!%p2830_p9), %s2284_s13, 512, %s2316_s7, %s2215_s27, %s2821_s26, %s2821_s26, %s2820_s17  }
  0xb8   : > { %s450_s23 = scalar_lea.vmem [#allocation8], %s2165_s24  ;;  %s2832_s8 = sand.u32 1, %s2010_s20  }
  0xb9   : > { %s457_s11 = sshll.u32 %s450_s23, 4  ;;  %s2354_s15 = scalar_lea.sflag [#allocation9], %s2832_s8  ;;  %s2350_s11 = int_to_ptr.vmem [resolvable:$true] %s457_s11 }
  0xba   : > { %s1806_s14 = scalar_lea.hbm %s2322_s9, 512  ;;  %s1811_s25 = scalar_lea.hbm %s2831_s3, 1024 }
  0xbb   : > { %p1807_p4 = scmp.ne.s32.totalorder %s2322_s9, %s1806_s14  ;;  %p1812_p7 = scmp.lt.u32.totalorder %s2322_s9, %s2831_s3 }
  0xbc   : > { %p1813_p0 = scmp.lt.u32.totalorder %s1811_s25, %s1806_s14  ;;  %p1815_p2 = scmp.lt.u32.totalorder %s1806_s14, %s2322_s9 }
  0xbd   : > { %p1809_p13 = pnand %p1807_p4, %p2829_p12 }
  0xbe   : > { %p1814_p6 = por %p1813_p0, %p1812_p7 }
  0xbf   : > { %p1810_p3 = pneg %p1809_p13 }
  0xc0   : > { %p1816_p8 = por %p1815_p2, %p1814_p6 }
  0xc2   : > { %p1817_p10 = pnand %p1816_p8, %p1810_p3 }
  0xc4   : > { %1820 = shalt.err (!%p1817_p10)
}
  0xc5   : > { %s1821_s24 = scalar_lea.vmem %s2350_s11, 512  ;;  %s2019_s27 = smov [#allocation8]  }
  0xc6   : > { %p1822_p1 = scmp.ne.s32.totalorder %s2350_s11, %s1821_s24  ;;  %s1826_s13 = sshll.u32 %s2019_s27, 4  ;;  %s1827_s13 = int_to_ptr.vmem [resolvable:$false] %s1826_s13 }
  0xc7   : > { %s1828_s7 = scalar_lea.vmem %s1827_s13, 1024  ;;  %p1829_p4 = scmp.lt.s32.totalorder %s2350_s11, %s1827_s13 }
  0xc8   : > { %p1824_p5 = pnand %p1822_p1, %p2829_p12  ;;  %p1830_p13 = scmp.lt.s32.totalorder %s1828_s7, %s1821_s24 }
  0xca   : > { %p1825_p11 = pneg %p1824_p5  ;;  %p1831_p7 = por %p1830_p13, %p1829_p4 }
  0xcc   : > { %p1832_p0 = pnand %p1831_p7, %p1825_p11 }
  0xce   : > { %1835 = shalt.err (!%p1832_p0)
}
  0xcf   : > { %1586 = dma.hbm_to_vmem [thread:$0]  (!%p2830_p9), %s2322_s9, 512, %s2350_s11, %s2354_s15, %s2821_s26, %s2821_s26, %s2820_s17  }
  0xd0   : > { %p2833_p12 = scmp.ne.s32.totalorder %s2812_s12, 0 }
  0xd1   : > { %s2384_s22 = sand.u32 (!%p2833_p12), 1, %s2002_s18   ;;  %p2834_p3 = scmp.ne.s32.totalorder (!%p2833_p12), %s2807_s28, 0 }
  0xd2   : > { %469 = sbr.rel (%p2833_p12) target bundleno = 820 (0x334), region = 52  ;;  %s2387_s10 = sshll.u32 (!%p2833_p12), %s2384_s22, 5 }
  0xd3   : > { %s472_s16 = scalar_lea.sflag (!%p2833_p12), [#allocation3], %s2384_s22  ;;  %s2391_s0 = scalar_lea.vmem (!%p2833_p12), [#allocation2], %s2387_s10 }
  0xd9   : > { %1965 = dma.done.wait (%p2834_p3), %s472_s16, 512  }
  0xda   : > { %1967 = vsyncadd (%p2834_p3), %s472_s16, 4294966784  ;;  %s2398_s12 = sand.u32 1, %s2107_s21   ;;  %s2402_s26 = scalar_lea.vmem [#allocation5], %s2387_s10 }
  0xdb   : > { %s481_s17 = scalar_lea.sflag [#allocation6], %s2398_s12 }
  0xdc   : > { %1969 = dma.done.wait (%p2834_p3), %s481_s17, 1024  }
  0xdd   : > { %1971 = vsyncadd (%p2834_p3), %s481_s17, 4294966272  ;;  %s2409_s9 = scalar_lea.vmem [#allocation7], %s2387_s10  ;;  %s499_s23 = scalar_lea.sflag [#allocation9], %s2398_s12 }
  0xde   : > { %s2413_s11 = scalar_lea.vmem [#allocation8], %s2387_s10 }
  0xdf   : > { %1973 = dma.done.wait (%p2834_p3), %s499_s23, 512  }
  0xe0   : > { %1975 = vsyncadd (%p2834_p3), %s499_s23, 4294966784  ;;  %p2835_p9 = scmp.eq.s32.totalorder %s2107_s21, 0 }
  0xe2   : > { %1977 = dma.done.wait (%p2835_p9), [#allocation9], 2048   ;;  %p2836_p6 = pmov %p2835_p9 }
  0xe4   : > { %1979 = vsyncadd (%p2836_p6), [#allocation9], 4294965248  ;;  %p2837_p2 = pmov %p2836_p6 }
  0xe6   : > { %1981 = dma.done.wait (%p2837_p2), [#allocation12], 2048   ;;  %p2838_p8 = pmov %p2837_p2 }
  0xe7   : > { %v703_v0 = vld [vmem:[#allocation10] sm:$0xff]  ;;  %v704_v1 = vld [vmem:[#allocation10 + $0x8] sm:$0xff]  ;;  %v705_v2 = vld [vmem:[#allocation10 + $0x10] sm:$0xff]  ;;  %s2845_s5 = sld [smem:[#allocation37_spill]]  ;;  %s2846_s4 = sld [smem:[#allocation39_spill]] }
  0xe8   : > { %1983 = vsyncadd (%p2838_p8), [#allocation12], 4294965248  ;;  %v1479_v3 = vpack.c.bf16 %v704_v1, %v703_v0  ;;  %v706_v4 = vld [vmem:[#allocation10 + $0x18] sm:$0xff]  ;;  %v707_v6 = vld [vmem:[#allocation10 + $0x20] sm:$0xff]  ;;  %s2552_s1 = scalar_lea.vmem [#allocation13], %s2387_s10  ;;  %s2556_s30 = scalar_lea.vmem [#allocation14], %s2387_s10 }
  0xe9   : > { %v1483_v5 = vpack.c.bf16 %v706_v4, %v705_v2  ;;  %v708_v7 = vld [vmem:[#allocation10 + $0x28] sm:$0xff]  ;;  %v709_v8 = vld [vmem:[#allocation10 + $0x30] sm:$0xff]  ;;  %v710_v10 = vld [vmem:[#allocation10 + $0x38] sm:$0xff]  ;;  %s1012_s25 = sshll.u32 %s2552_s1, 4  ;;  %s1028_s29 = sshll.u32 %s2556_s30, 4  ;;  %s2575_s25 = int_to_ptr.vmem [resolvable:$true] %s1012_s25  ;;  %s2582_s29 = int_to_ptr.vmem [resolvable:$true] %s1028_s29 }
  0xea   : > { %1480 = vmatprep.subr.bf16.mxu0 %v1479_v3  ;;  %v1487_v9 = vpack.c.bf16 %v708_v7, %v707_v6  ;;  %v2428_v11 = vld [vmem:[%s2391_s0] sm:$0xff]  ;;  %v712_v18 = vld [vmem:[#allocation10 + $0x48] sm:$0xff]  ;;  %v1491_v21 = vpack.c.bf16 %v710_v10, %v709_v8  ;;  %v713_v22 = vld [vmem:[#allocation10 + $0x50] sm:$0xff]  ;;  %s2560_s24 = scalar_lea.vmem [#allocation16], %s2387_s10  ;;  %s2571_s13 = scalar_lea.vmem [#allocation17], %s2387_s10 }
  0xeb   : > { %1482 = vmatpush3.bf16.msra.mxu0 %v1479_v3  ;;  %v2431_v12 = vld [vmem:[%s2402_s26] sm:$0xff]  ;;  %v603_v15 = vsub.f32 0.2, %v2428_v11  ;;  %v714_v23 = vld [vmem:[#allocation10 + $0x58] sm:$0xff]  ;;  %v2450_v26 = vld [vmem:[%s2391_s0 + $0x8] sm:$0xff]  ;;  %s1044_s27 = sshll.u32 %s2560_s24, 4  ;;  %s2584_s27 = int_to_ptr.vmem [resolvable:$true] %s1044_s27 }
  0xec   : > { %1484 = vmatprep.subr.bf16.mxu0 %v1483_v5  ;;  %v2434_v13 = vld [vmem:[%s2409_s9] sm:$0xff]  ;;  %v607_v16 = vsub.f32 0.1, %v2431_v12  ;;  %vm611_vm0 = vcmp.lt.f32.partialorder %v2431_v12, 0.05  ;;  %v2457_v29 = vld [vmem:[%s2402_s26 + $0x8] sm:$0xff]  ;;  %v1499_v45 = vpack.c.bf16 %v714_v23, %v713_v22 }
  0xed   : > { %v2437_v14 = vld [vmem:[%s2413_s11] sm:$0xff]  ;;  %vm615_vm1 = vcmp.gt.f32.partialorder %v2431_v12, 0.15  ;;  %v639_v19 = vsub.f32 0.9, %v2434_v13  ;;  %v2460_v30 = vld [vmem:[%s2409_s9 + $0x8] sm:$0xff] }
  0xee   : > { %v711_v17 = vld [vmem:[#allocation10 + $0x40] sm:$0xff]  ;;  %vm619_vm2 = vmor %vm611_vm0, %vm615_vm1  ;;  %v623_v20 = vmul.f32 2.0, %v607_v16  ;;  %vm643_vm3 = vcmp.lt.f32.partialorder %v2434_v13, 0.85  ;;  %vm647_vm4 = vcmp.gt.f32.partialorder %v2434_v13, 0.95 }
  0xef   : > { %1486 = vmatpush3.bf16.msra.mxu0 %v1483_v5  ;;  %vm679_vm5 = vcmp.gt.f32.partialorder %v2437_v14, 0.25  ;;  %vm651_vm6 = vmor %vm643_vm3, %vm647_vm4  ;;  %v655_v24 = vmul.f32 2.0, %v639_v19  ;;  %v671_v25 = vsub.f32 0.2, %v2437_v14  ;;  %vm675_vm7 = vcmp.lt.f32.partialorder %v2437_v14, 0.15 }
  0xf0   : > { %1488 = vmatprep.subr.bf16.mxu0 %v1487_v9  ;;  %v627_v27 = vsel %vm619_vm2, %v623_v20, %v607_v16  ;;  %vm2452_vm8 = vmor %vm675_vm7, %vm679_vm5  ;;  %v604_v31 = vsub.f32 0.2, %v2450_v26  ;;  %v2464_v35 = vld [vmem:[%s2413_s11 + $0x8] sm:$0xff]  ;;  %v608_v36 = vsub.f32 0.1, %v2457_v29  ;;  %v1495_v37 = vpack.c.bf16 %v712_v18, %v711_v17  ;;  %v2473_v43 = vld [vmem:[%s2391_s0 + $0x10] sm:$0xff] }
  0xf1   : > { %v631_v32 = vmul.f32 0.2, %v627_v27  ;;  %v659_v33 = vsel %vm651_vm6, %v655_v24, %v639_v19  ;;  %v687_v34 = vmul.f32 2.0, %v671_v25  ;;  %vm612_vm9 = vcmp.lt.f32.partialorder %v2457_v29, 0.05  ;;  %v2476_v44 = vld [vmem:[%s2402_s26 + $0x10] sm:$0xff] }
  0xf2   : > { %v663_v38 = vmul.f32 0.2, %v659_v33  ;;  %vm616_vm10 = vcmp.gt.f32.partialorder %v2457_v29, 0.15  ;;  %v624_v41 = vmul.f32 2.0, %v608_v36  ;;  %v715_v46 = vld [vmem:[#allocation10 + $0x60] sm:$0xff] }
  0xf3   : > { %1490 = vmatpush3.bf16.msra.mxu0 %v1487_v9  ;;  %v635_v39 = vadd.f32 %v631_v32, %v603_v15  ;;  %v691_v40 = vsel %vm2452_vm8, %v687_v34, %v671_v25  ;;  %vm620_vm11 = vmor %vm612_vm9, %vm616_vm10  ;;  %v640_v42 = vsub.f32 0.9, %v2460_v30  ;;  %v716_v47 = vld [vmem:[#allocation10 + $0x68] sm:$0xff]  ;;  %vm644_vm12 = vcmp.lt.f32.partialorder %v2460_v30, 0.85  ;;  %v2482_v53 = vld [vmem:[%s2409_s9 + $0x10] sm:$0xff] }
  0xf4   : > { %1492 = vmatprep.subr.bf16.mxu0 %v1491_v21  ;;  %v695_v48 = vmul.f32 0.2, %v691_v40  ;;  %vm648_vm13 = vcmp.gt.f32.partialorder %v2460_v30, 0.95  ;;  %v628_v50 = vsel %vm620_vm11, %v624_v41, %v608_v36  ;;  %v672_v52 = vsub.f32 0.2, %v2464_v35 }
  0xf5   : > { %v667_v49 = vadd.f32 %v663_v38, %v635_v39  ;;  %vm652_vm14 = vmor %vm644_vm12, %vm648_vm13  ;;  %v656_v51 = vmul.f32 2.0, %v640_v42  ;;  %v2485_v54 = vld [vmem:[%s2413_s11 + $0x10] sm:$0xff]  ;;  %v632_v55 = vmul.f32 0.2, %v628_v50  ;;  %vm676_vm15 = vcmp.lt.f32.partialorder %v2464_v35, 0.15 }
  0xf6   : > { %vm680_vm0 = vcmp.gt.f32.partialorder %v2464_v35, 0.25  ;;  %vm681_vm1 = vcmp.gt.f32.partialorder %v2485_v54, 0.25  ;;  %v717_v56 = vld [vmem:[#allocation10 + $0x70] sm:$0xff]  ;;  %v718_v57 = vld [vmem:[#allocation10 + $0x78] sm:$0xff]  ;;  %v688_v60 = vmul.f32 2.0, %v672_v52  ;;  %v1503_v1 = vpack.c.bf16 %v716_v47, %v715_v46  ;;  %v848_v16 = vld [vmem:[#allocation11 + $0x68] sm:$0xff] }
  0xf7   : > { %1494 = vmatpush3.bf16.msra.mxu0 %v1491_v21  ;;  %v699_v58 = vadd.f32 %v695_v48, %v667_v49  ;;  %v660_v59 = vsel %vm652_vm14, %v656_v51, %v640_v42  ;;  %v605_v61 = vsub.f32 0.2, %v2473_v43  ;;  %v609_v62 = vsub.f32 0.1, %v2476_v44  ;;  %v2494_v63 = vld [vmem:[%s2391_s0 + $0x18] sm:$0xff]  ;;  %vm2503_vm3 = vmor %vm676_vm15, %vm680_vm0  ;;  %v841_v2 = vld [vmem:[#allocation11 + $0x30] sm:$0xff] }
  0xf8   : > { %1496 = vmatprep.subr.bf16.mxu0 %v1495_v37  ;;  %vm613_vm2 = vcmp.lt.f32.partialorder %v2476_v44, 0.05  ;;  %v2497_v0 = vld [vmem:[%s2402_s26 + $0x18] sm:$0xff]  ;;  %vm617_vm4 = vcmp.gt.f32.partialorder %v2476_v44, 0.15  ;;  %v1507_v4 = vpack.c.bf16 %v718_v57, %v717_v56  ;;  %v636_v7 = vadd.f32 %v632_v55, %v604_v31  ;;  %v835_v55 = vld [vmem:[#allocation11] sm:$0xff] }
  0xf9   : > { %1435 = vmatprep.mubr.f32.mxu0 %v699_v58  ;;  %v641_v3 = vsub.f32 0.9, %v2482_v53  ;;  %vm645_vm5 = vcmp.lt.f32.partialorder %v2482_v53, 0.85  ;;  %v664_v5 = vmul.f32 0.2, %v660_v59  ;;  %vm621_vm6 = vmor %vm613_vm2, %vm617_vm4  ;;  %v692_v10 = vsel %vm2503_vm3, %v688_v60, %v672_v52 }
  0xfa   : > { %v625_v6 = vmul.f32 2.0, %v609_v62  ;;  %vm649_vm7 = vcmp.gt.f32.partialorder %v2482_v53, 0.95  ;;  %v673_v9 = vsub.f32 0.2, %v2485_v54  ;;  %v2522_v17 = vld [vmem:[%s2409_s9 + $0x18] sm:$0xff] }
  0xfb   : > { %1498 = vmatpush3.bf16.msra.mxu0 %v1495_v37  ;;  %vm653_vm8 = vmor %vm645_vm5, %vm649_vm7  ;;  %v657_v8 = vmul.f32 2.0, %v641_v3  ;;  %vm677_vm9 = vcmp.lt.f32.partialorder %v2485_v54, 0.15  ;;  %v606_v18 = vsub.f32 0.2, %v2494_v63  ;;  %v2527_v23 = vld [vmem:[%s2413_s11 + $0x18] sm:$0xff]  ;;  %v668_v36 = vadd.f32 %v664_v5, %v636_v7 }
  0xfc   : > { %1500 = vmatprep.subr.bf16.mxu0 %v1499_v45  ;;  %v629_v15 = vsel %vm621_vm6, %v625_v6, %v609_v62  ;;  %vm2517_vm10 = vmor %vm677_vm9, %vm681_vm1  ;;  %v610_v19 = vsub.f32 0.1, %v2497_v0  ;;  %v689_v22 = vmul.f32 2.0, %v673_v9  ;;  %vm614_vm11 = vcmp.lt.f32.partialorder %v2497_v0, 0.05  ;;  %v836_v56 = vld [vmem:[#allocation11 + $0x8] sm:$0xff] }
  0xfd   : > { %v633_v20 = vmul.f32 0.2, %v629_v15  ;;  %v661_v21 = vsel %vm653_vm8, %v657_v8, %v641_v3  ;;  %vm618_vm12 = vcmp.gt.f32.partialorder %v2497_v0, 0.15  ;;  %vm682_vm13 = vcmp.gt.f32.partialorder %v2527_v23, 0.25  ;;  %v837_v58 = vld [vmem:[#allocation11 + $0x10] sm:$0xff] }
  0xfe   : > { %v665_v24 = vmul.f32 0.2, %v661_v21  ;;  %v626_v25 = vmul.f32 2.0, %v610_v19  ;;  %v693_v28 = vsel %vm2517_vm10, %v689_v22, %v673_v9  ;;  %vm622_vm14 = vmor %vm614_vm11, %vm618_vm12  ;;  %v642_v31 = vsub.f32 0.9, %v2522_v17  ;;  %v838_v59 = vld [vmem:[#allocation11 + $0x18] sm:$0xff] }
  0xff   : > { %1502 = vmatpush3.bf16.msra.mxu0 %v1499_v45  ;;  %v637_v27 = vadd.f32 %v633_v20, %v605_v61  ;;  %vm646_vm15 = vcmp.lt.f32.partialorder %v2522_v17, 0.85  ;;  %v696_v32 = vmul.f32 0.2, %v692_v10  ;;  %vm650_vm0 = vcmp.gt.f32.partialorder %v2522_v17, 0.95 }
 0x100   : > { %1504 = vmatprep.subr.bf16.mxu0 %v1503_v1  ;;  %v630_v33 = vsel %vm622_vm14, %v626_v25, %v610_v19  ;;  %v674_v34 = vsub.f32 0.2, %v2527_v23  ;;  %vm654_vm1 = vmor %vm646_vm15, %vm650_vm0  ;;  %v658_v38 = vmul.f32 2.0, %v642_v31  ;;  %vm678_vm2 = vcmp.lt.f32.partialorder %v2527_v23, 0.15  ;;  %v839_v61 = vld [vmem:[#allocation11 + $0x20] sm:$0xff] }
 0x101   : > { %v634_v37 = vmul.f32 0.2, %v630_v33  ;;  %v669_v39 = vadd.f32 %v665_v24, %v637_v27  ;;  %v697_v40 = vmul.f32 0.2, %v693_v28  ;;  %vm686_vm3 = vmor %vm678_vm2, %vm682_vm13  ;;  %v700_v48 = vadd.f32 %v696_v32, %v668_v36  ;;  %v840_v62 = vld [vmem:[#allocation11 + $0x28] sm:$0xff]  ;;  %v842_v3 = vld [vmem:[#allocation11 + $0x38] sm:$0xff] }
 0x102   : > { %v690_v41 = vmul.f32 2.0, %v674_v34  ;;  %v662_v45 = vsel %vm654_vm1, %v658_v38, %v642_v31  ;;  %v1511_v57 = vpack.c.bf16 %v836_v56, %v835_v55  ;;  %v1515_v60 = vpack.c.bf16 %v838_v59, %v837_v58  ;;  %v843_v5 = vld [vmem:[#allocation11 + $0x40] sm:$0xff]  ;;  %v844_v6 = vld [vmem:[#allocation11 + $0x48] sm:$0xff]  ;;  %v845_v8 = vld [vmem:[#allocation11 + $0x50] sm:$0xff]  ;;  %s1060_s7 = sshll.u32 %s2571_s13, 4  ;;  %s1359_s16 = sshll.u32 %s2107_s21, 9  ;;  %s2586_s7 = int_to_ptr.vmem [resolvable:$true] %s1060_s7 }
 0x103   : > { %1506 = vmatpush3.bf16.msra.mxu0 %v1503_v1  ;;  %v638_v42 = vadd.f32 %v634_v37, %v606_v18  ;;  %v666_v46 = vmul.f32 0.2, %v662_v45  ;;  %v701_v50 = vadd.f32 %v697_v40, %v669_v39  ;;  %v1519_v1 = vpack.c.bf16 %v840_v62, %v839_v61  ;;  %v846_v9 = vld [vmem:[#allocation11 + $0x58] sm:$0xff]  ;;  %v847_v15 = vld [vmem:[#allocation11 + $0x60] sm:$0xff]  ;;  %v849_v19 = vld [vmem:[#allocation11 + $0x70] sm:$0xff]  ;;  %s2847_s0 = sld [smem:[#allocation41_spill]] }
 0x104   : > { %1508 = vmatprep.subr.bf16.mxu0 %v1507_v4  ;;  %v694_v47 = vsel %vm686_vm3, %v690_v41, %v674_v34  ;;  %1512 = vmatprep.subr.bf16.mxu1 %v1511_v57  ;;  %v1527_v7 = vpack.c.bf16 %v844_v6, %v843_v5  ;;  %v1531_v10 = vpack.c.bf16 %v846_v9, %v845_v8  ;;  %v850_v20 = vld [vmem:[#allocation11 + $0x78] sm:$0xff]  ;;  %v1339_v22 = vld [vmem:[%s2845_s5] ss:$0 sm:$0xff]  ;;  %s2848_s17 = sld [smem:[#allocation30_spill]]  ;;  %s2849_s11 = sld [smem:[#allocation40_spill]] }
 0x105   : > { %v698_v49 = vmul.f32 0.2, %v694_v47  ;;  %v670_v51 = vadd.f32 %v666_v46, %v638_v42  ;;  %1514 = vmatpush3.bf16.msra.mxu1 %v1511_v57  ;;  %v1535_v18 = vpack.c.bf16 %v848_v16, %v847_v15  ;;  %v1539_v21 = vpack.c.bf16 %v850_v20, %v849_v19  ;;  %s2850_s14 = sld [smem:[#allocation42_spill]]  ;;  %s2851_s2 = sld [smem:[#allocation43_spill]] }
 0x106   : > { %1516 = vmatprep.subr.bf16.mxu1 %v1515_v60  ;;  %s989_s5 = scalar_lea.sflag [#allocation15], %s2398_s12  ;;  %s1836_s6 = scalar_lea.vmem %s2582_s29, 512 }
 0x107   : > { %1510 = vmatpush3.bf16.msra.mxu0 %v1507_v4  ;;  %v702_v52 = vadd.f32 %v698_v49, %v670_v51  ;;  %v1523_v4 = vpack.c.bf16 %v842_v3, %v841_v2  ;;  %p1837_p10 = scmp.ne.s32.totalorder %s2582_s29, %s1836_s6  ;;  %s2020_s9 = smov [#allocation14]  }
 0x108   : > { %s1840_s23 = sshll.u32 %s2020_s9, 4  ;;  %s1841_s23 = int_to_ptr.vmem [resolvable:$false] %s1840_s23 }
 0x109   : > { %1518 = vmatpush3.bf16.msra.mxu1 %v1515_v60  ;;  %v1340_v60 = vld [vmem:[%s2846_s4] ss:$0 sm:$0xff]  ;;  %s2599_s26 = scalar_lea.hbm %s2847_s0, %s1359_s16  ;;  %s1842_s8 = scalar_lea.vmem %s1841_s23, 1024 }
 0x10a   : > { %1436 = vmatmul.mubr.f32.vlgmr.msra.gmra.mrb[0].mxu0 %v700_v48  ;;  %1520 = vmatprep.subr.bf16.mxu1 %v1519_v1  ;;  %s2608_s28 = scalar_lea.hbm %s2849_s11, %s1359_s16  ;;  %p2852_p1 = scmp.ne.s32.totalorder %s2848_s17, 0 }
 0x10b   : > { %1438 = vmatprep.mubr.f32.mxu0 %v701_v50  ;;  %s2613_s4 = scalar_lea.hbm %s2850_s14, %s1359_s16  ;;  %s2622_s3 = scalar_lea.hbm %s2851_s2, %s1359_s16 }
 0x10c   : > { %p1838_p5 = pnand %p1837_p10, %p2852_p1  ;;  %p1843_p4 = scmp.lt.s32.totalorder %s2582_s29, %s1841_s23 }
 0x10d   : > { %1522 = vmatpush3.bf16.msra.mxu1 %v1519_v1  ;;  %p1844_p13 = scmp.lt.s32.totalorder %s1842_s8, %s1836_s6 }
 0x10e   : > { %1439 = vmatmul.mubr.f32.gmra.mrb[2].mxu0 %v702_v52  ;;  %1524 = vmatprep.subr.bf16.mxu1 %v1523_v4  ;;  %p1839_p11 = pneg %p1838_p5 }
 0x10f   : > { %p1845_p7 = por %p1844_p13, %p1843_p4 }
 0x111   : > { %1526 = vmatpush3.bf16.msra.mxu1 %v1523_v4  ;;  %p1846_p0 = pnand %p1845_p7, %p1839_p11 }
 0x112   : > { %1528 = vmatprep.subr.bf16.mxu1 %v1527_v7 }
 0x115   : > { %1530 = vmatpush3.bf16.msra.mxu1 %v1527_v7 }
 0x116   : > { %1532 = vmatprep.subr.bf16.mxu1 %v1531_v10 }
 0x119   : > { %1534 = vmatpush3.bf16.msra.mxu1 %v1531_v10 }
 0x11a   : > { %1536 = vmatprep.subr.bf16.mxu1 %v1535_v18 }
 0x11d   : > { %1538 = vmatpush3.bf16.msra.mxu1 %v1535_v18 }
 0x11e   : > { %1540 = vmatprep.subr.bf16.mxu1 %v1539_v21 }
 0x121   : > { %1542 = vmatpush3.bf16.msra.mxu1 %v1539_v21 }
 0x1dd   : > { %v1437_v24 = vpop.f32.mrb[0].mxu0 }
 0x1de   : > { %v798_v25 = vadd.f32 %v1437_v24, %v1339_v22  ;;  %v792_v27 = vpop.f32.mrb[1].mxu0 }
 0x1df   : > { %v793_v28 = vadd.f32 %v1339_v22, %v792_v27 }
 0x1e0   : > { %v812_v31 = vsub.f32 0.0, %v798_v25 }
 0x1e1   : > { %v811_v32 = vsub.f32 0.0, %v793_v28  ;;  %v1440_v33 = vpop.f32.mrb[2].mxu0 }
 0x1e2   : > { %v817_v34 = vmul.f32 1.442695, %v812_v31  ;;  %v808_v36 = vadd.f32 %v1440_v33, %v1339_v22  ;;  %v802_v37 = vpop.f32.mrb[3].mxu0 }
 0x1e3   : > { %v815_v38 = vmul.f32 1.442695, %v811_v32  ;;  %v803_v39 = vadd.f32 %v1339_v22, %v802_v37 }
 0x1e4   : > { %1644 = vpow2.f32 %v817_v34  ;;  %v814_v40 = vsub.f32 0.0, %v808_v36 }
 0x1e5   : > { %1646 = vpow2.f32 %v815_v38  ;;  %v813_v41 = vsub.f32 0.0, %v803_v39 }
 0x1e6   : > { %v821_v42 = vmul.f32 1.442695, %v814_v40 }
 0x1e7   : > { %v819_v45 = vmul.f32 1.442695, %v813_v41 }
 0x1e8   : > { %1648 = vpow2.f32 %v821_v42 }
 0x1e9   : > { %1650 = vpow2.f32 %v819_v45 }
 0x1ee   : > { %v1645_v46 = vpop.eup %1644 }
 0x1ef   : > { %v1647_v47 = vpop.eup %1646  ;;  %v824_v48 = vadd.f32 1.0, %v1645_v46 }
 0x1f0   : > { %v823_v49 = vadd.f32 1.0, %v1647_v47 }
 0x1f2   : > { %v1649_v50 = vpop.eup %1648  ;;  %1652 = vrcp.f32 %v823_v49 }
 0x1f3   : > { %v1651_v51 = vpop.eup %1650  ;;  %1654 = vrcp.f32 %v824_v48  ;;  %v826_v52 = vadd.f32 1.0, %v1649_v50 }
 0x1f4   : > { %v825_v55 = vadd.f32 1.0, %v1651_v51 }
 0x1f6   : > { %1656 = vrcp.f32 %v825_v55 }
 0x1f7   : > { %1658 = vrcp.f32 %v826_v52 }
 0x1fc   : > { %v1653_v56 = vpop.eup %1652 }
 0x1fd   : > { %v1655_v57 = vpop.eup %1654  ;;  %1473 = vmatprep.mubr.f32.mxu1 %v1653_v56 }
 0x1fe   : > { %1474 = vmatmul.mubr.f32.vlgmr.msra.gmra.mrb[0].mxu1 %v1655_v57 }
 0x200   : > { %v1657_v58 = vpop.eup %1656 }
 0x201   : > { %v1659_v59 = vpop.eup %1658  ;;  %1476 = vmatprep.mubr.f32.mxu1 %v1657_v58 }
 0x202   : > { %1477 = vmatmul.mubr.f32.gmra.mrb[2].mxu1 %v1659_v59 }
 0x2d1   : > { %v1475_v61 = vpop.f32.mrb[0].mxu1 }
 0x2d2   : > { %v930_v62 = vadd.f32 %v1475_v61, %v1340_v60  ;;  %v924_v1 = vpop.f32.mrb[1].mxu1 }
 0x2d3   : > { %v925_v2 = vadd.f32 %v1340_v60, %v924_v1 }
 0x2d4   : > { %v944_v3 = vmul.f32 0.1, %v930_v62  ;;  %v948_v4 = vmul.f32 0.05, %v930_v62 }
 0x2d5   : > { %v943_v5 = vmul.f32 0.1, %v925_v2  ;;  %v947_v6 = vmul.f32 0.05, %v925_v2  ;;  %v1478_v7 = vpop.f32.mrb[2].mxu1 }
 0x2d6   : > { %v952_v8 = vadd.f32 %v944_v3, %v2450_v26  ;;  %v960_v9 = vadd.f32 %v948_v4, %v2457_v29  ;;  %v968_v10 = vadd.f32 %v948_v4, %v2460_v30  ;;  %v976_v15 = vadd.f32 %v948_v4, %v2464_v35  ;;  %v934_v16 = vpop.f32.mrb[3].mxu1 }
 0x2d7   : > { %v951_v26 = vadd.f32 %v943_v5, %v2428_v11  ;;  %v959_v29 = vadd.f32 %v947_v6, %v2431_v12  ;;  %v967_v30 = vadd.f32 %v947_v6, %v2434_v13  ;;  %v975_v35 = vadd.f32 %v947_v6, %v2437_v14 }
 0x2d8   : > { %956 = vst [vmem:[%s2552_s1 + $0x8] sm:$0xff] %v952_v8  ;;  %964 = vst [vmem:[%s2556_s30 + $0x8] sm:$0xff] %v960_v9  ;;  %v940_v18 = vadd.f32 %v1478_v7, %v1340_v60  ;;  %v935_v19 = vadd.f32 %v1340_v60, %v934_v16 }
 0x2d9   : > { %972 = vst [vmem:[%s2560_s24 + $0x8] sm:$0xff] %v968_v10  ;;  %980 = vst [vmem:[%s2571_s13 + $0x8] sm:$0xff] %v976_v15 }
 0x2da   : > { %955 = vst [vmem:[%s2552_s1] sm:$0xff] %v951_v26  ;;  %963 = vst [vmem:[%s2556_s30] sm:$0xff] %v959_v29  ;;  %v946_v11 = vmul.f32 0.1, %v940_v18  ;;  %v950_v12 = vmul.f32 0.05, %v940_v18  ;;  %v945_v13 = vmul.f32 0.1, %v935_v19 }
 0x2db   : > { %971 = vst [vmem:[%s2560_s24] sm:$0xff] %v967_v30  ;;  %979 = vst [vmem:[%s2571_s13] sm:$0xff] %v975_v35  ;;  %v949_v14 = vmul.f32 0.05, %v935_v19 }
 0x2dc   : > { %v954_v20 = vadd.f32 %v946_v11, %v2494_v63  ;;  %v962_v21 = vadd.f32 %v950_v12, %v2497_v0  ;;  %v970_v22 = vadd.f32 %v950_v12, %v2522_v17  ;;  %v978_v24 = vadd.f32 %v950_v12, %v2527_v23 }
 0x2dd   : > { %v953_v25 = vadd.f32 %v945_v13, %v2473_v43  ;;  %v961_v27 = vadd.f32 %v949_v14, %v2476_v44  ;;  %v969_v28 = vadd.f32 %v949_v14, %v2482_v53  ;;  %v977_v63 = vadd.f32 %v949_v14, %v2485_v54 }
 0x2de   : > { %958 = vst [vmem:[%s2552_s1 + $0x18] sm:$0xff] %v954_v20  ;;  %966 = vst [vmem:[%s2556_s30 + $0x18] sm:$0xff] %v962_v21 }
 0x2df   : > { %974 = vst [vmem:[%s2560_s24 + $0x18] sm:$0xff] %v970_v22  ;;  %982 = vst [vmem:[%s2571_s13 + $0x18] sm:$0xff] %v978_v24 }
 0x2e0   : > { %957 = vst [vmem:[%s2552_s1 + $0x10] sm:$0xff] %v953_v25  ;;  %965 = vst [vmem:[%s2556_s30 + $0x10] sm:$0xff] %v961_v27 }
 0x2e1   : > { %973 = vst [vmem:[%s2560_s24 + $0x10] sm:$0xff] %v969_v28  ;;  %981 = vst [vmem:[%s2571_s13 + $0x10] sm:$0xff] %v977_v63 }
 0x2e2   : > { %1849 = shalt.err (!%p1846_p0)
}
 0x2e3   : > { %s1850_s1 = scalar_lea.hbm %s2599_s26, 512  ;;  %s1854_s13 = scalar_lea.hbm %s2847_s0, 1024 }
 0x2e4   : > { %p1851_p12 = scmp.ne.s32.totalorder %s2599_s26, %s1850_s1  ;;  %p1855_p6 = scmp.lt.u32.totalorder %s2599_s26, %s2847_s0 }
 0x2e5   : > { %p1856_p2 = scmp.lt.u32.totalorder %s1854_s13, %s1850_s1  ;;  %p1858_p10 = scmp.lt.u32.totalorder %s1850_s1, %s2599_s26 }
 0x2e6   : > { %p1852_p3 = pnand %p1851_p12, %p2852_p1 }
 0x2e7   : > { %p1857_p8 = por %p1856_p2, %p1855_p6 }
 0x2e8   : > { %p1853_p9 = pneg %p1852_p3 }
 0x2e9   : > { %p1859_p5 = por %p1858_p10, %p1857_p8 }
 0x2eb   : > { %p1860_p11 = pnand %p1859_p5, %p1853_p9 }
 0x2ed   : > { %1863 = shalt.err (!%p1860_p11)
}
 0x2ee   : > { %s2021_s6 = smov 128   ;;  %s2022_s21 = smov 8  }
 0x2ef   : > { %1560 = dma.vmem_to_hbm [thread:$0]  (%p2852_p1), %s2582_s29, 512, %s2599_s26, %s989_s5, %s2021_s6, %s2021_s6, %s2022_s21  }
 0x2f0   : > { %s984_s10 = scalar_lea.sflag [#allocation4], %s2384_s22  ;;  %s1864_s9 = scalar_lea.vmem %s2575_s25, 512 }
 0x2f1   : > { %p1865_p4 = scmp.ne.s32.totalorder %s2575_s25, %s1864_s9  ;;  %s2023_s23 = smov [#allocation13]  }
 0x2f2   : > { %s1868_s8 = sshll.u32 %s2023_s23, 4  ;;  %s1869_s8 = int_to_ptr.vmem [resolvable:$false] %s1868_s8 }
 0x2f3   : > { %p1866_p13 = pnand %p1865_p4, %p2852_p1  ;;  %s1870_s1 = scalar_lea.vmem %s1869_s8, 1024 }
 0x2f4   : > { %p1871_p0 = scmp.lt.s32.totalorder %s2575_s25, %s1869_s8  ;;  %p1872_p12 = scmp.lt.s32.totalorder %s1870_s1, %s1864_s9 }
 0x2f5   : > { %p1867_p7 = pneg %p1866_p13 }
 0x2f6   : > { %p1873_p3 = por %p1872_p12, %p1871_p0 }
 0x2f8   : > { %p1874_p9 = pnand %p1873_p3, %p1867_p7 }
 0x2fa   : > { %1877 = shalt.err (!%p1874_p9)
}
 0x2fb   : > { %s1878_s29 = scalar_lea.hbm %s2608_s28, 512  ;;  %s1882_s24 = scalar_lea.hbm %s2849_s11, 1024 }
 0x2fc   : > { %p1879_p6 = scmp.ne.s32.totalorder %s2608_s28, %s1878_s29  ;;  %p1883_p10 = scmp.lt.u32.totalorder %s2608_s28, %s2849_s11 }
 0x2fd   : > { %p1884_p5 = scmp.lt.u32.totalorder %s1882_s24, %s1878_s29  ;;  %p1886_p4 = scmp.lt.u32.totalorder %s1878_s29, %s2608_s28 }
 0x2fe   : > { %p1880_p2 = pnand %p1879_p6, %p2852_p1 }
 0x2ff   : > { %p1885_p11 = por %p1884_p5, %p1883_p10 }
 0x300   : > { %p1881_p8 = pneg %p1880_p2 }
 0x301   : > { %p1887_p13 = por %p1886_p4, %p1885_p11 }
 0x303   : > { %p1888_p7 = pnand %p1887_p13, %p1881_p8 }
 0x305   : > { %1891 = shalt.err (!%p1888_p7)
}
 0x306   : > { %1559 = dma.vmem_to_hbm [thread:$0]  (%p2852_p1), %s2575_s25, 512, %s2608_s28, %s984_s10, %s2021_s6, %s2021_s6, %s2022_s21  }
 0x307   : > { %s1892_s15 = scalar_lea.vmem %s2584_s27, 512  ;;  %s2024_s9 = smov [#allocation16]  }
 0x308   : > { %p1893_p0 = scmp.ne.s32.totalorder %s2584_s27, %s1892_s15  ;;  %s1896_s23 = sshll.u32 %s2024_s9, 4  ;;  %s1897_s23 = int_to_ptr.vmem [resolvable:$false] %s1896_s23 }
 0x309   : > { %s1898_s8 = scalar_lea.vmem %s1897_s23, 1024  ;;  %p1899_p9 = scmp.lt.s32.totalorder %s2584_s27, %s1897_s23 }
 0x30a   : > { %p1894_p12 = pnand %p1893_p0, %p2852_p1  ;;  %p1900_p6 = scmp.lt.s32.totalorder %s1898_s8, %s1892_s15 }
 0x30c   : > { %p1895_p3 = pneg %p1894_p12  ;;  %p1901_p2 = por %p1900_p6, %p1899_p9 }
 0x30e   : > { %p1902_p8 = pnand %p1901_p2, %p1895_p3 }
 0x310   : > { %1905 = shalt.err (!%p1902_p8)
}
 0x311   : > { %s1906_s25 = scalar_lea.hbm %s2613_s4, 512  ;;  %s1910_s1 = scalar_lea.hbm %s2850_s14, 1024 }
 0x312   : > { %p1907_p10 = scmp.ne.s32.totalorder %s2613_s4, %s1906_s25  ;;  %p1911_p4 = scmp.lt.u32.totalorder %s2613_s4, %s2850_s14 }
 0x313   : > { %p1912_p13 = scmp.lt.u32.totalorder %s1910_s1, %s1906_s25  ;;  %p1914_p0 = scmp.lt.u32.totalorder %s1906_s25, %s2613_s4 }
 0x314   : > { %p1908_p5 = pnand %p1907_p10, %p2852_p1 }
 0x315   : > { %p1913_p7 = por %p1912_p13, %p1911_p4 }
 0x316   : > { %p1909_p11 = pneg %p1908_p5 }
 0x317   : > { %p1915_p12 = por %p1914_p0, %p1913_p7 }
 0x319   : > { %p1916_p3 = pnand %p1915_p12, %p1909_p11 }
 0x31b   : > { %1919 = shalt.err (!%p1916_p3)
}
 0x31c   : > { %1561 = dma.vmem_to_hbm [thread:$0]  (%p2852_p1), %s2584_s27, 512, %s2613_s4, %s989_s5, %s2021_s6, %s2021_s6, %s2022_s21  }
 0x31d   : > { %s999_s30 = scalar_lea.sflag [#allocation18], %s2384_s22  ;;  %s1920_s24 = scalar_lea.vmem %s2586_s7, 512 }
 0x31e   : > { %p1921_p9 = scmp.ne.s32.totalorder %s2586_s7, %s1920_s24  ;;  %s2025_s13 = smov [#allocation17]  }
 0x31f   : > { %s1924_s16 = sshll.u32 %s2025_s13, 4  ;;  %s1925_s16 = int_to_ptr.vmem [resolvable:$false] %s1924_s16 }
 0x320   : > { %p1922_p6 = pnand %p1921_p9, %p2852_p1  ;;  %s1926_s15 = scalar_lea.vmem %s1925_s16, 1024 }
 0x321   : > { %p1927_p8 = scmp.lt.s32.totalorder %s2586_s7, %s1925_s16  ;;  %p1928_p10 = scmp.lt.s32.totalorder %s1926_s15, %s1920_s24 }
 0x322   : > { %p1923_p2 = pneg %p1922_p6 }
 0x323   : > { %p1929_p5 = por %p1928_p10, %p1927_p8 }
 0x325   : > { %p1930_p11 = pnand %p1929_p5, %p1923_p2 }
 0x327   : > { %1933 = shalt.err (!%p1930_p11)
}
 0x328   : > { %s1934_s5 = scalar_lea.hbm %s2622_s3, 512  ;;  %s1938_s4 = scalar_lea.hbm %s2851_s2, 1024 }
 0x329   : > { %p1935_p4 = scmp.ne.s32.totalorder %s2622_s3, %s1934_s5  ;;  %p1939_p0 = scmp.lt.u32.totalorder %s2622_s3, %s2851_s2 }
 0x32a   : > { %p1940_p12 = scmp.lt.u32.totalorder %s1938_s4, %s1934_s5  ;;  %p1942_p9 = scmp.lt.u32.totalorder %s1934_s5, %s2622_s3 }
 0x32b   : > { %p1936_p13 = pnand %p1935_p4, %p2852_p1 }
 0x32c   : > { %p1941_p3 = por %p1940_p12, %p1939_p0 }
 0x32d   : > { %p1937_p7 = pneg %p1936_p13 }
 0x32e   : > { %p1943_p6 = por %p1942_p9, %p1941_p3 }
 0x330   : > { %p1944_p2 = pnand %p1943_p6, %p1937_p7 }
 0x332   : > { %1947 = shalt.err (!%p1944_p2)
}
 0x333   : > { %1562 = dma.vmem_to_hbm [thread:$0]  (%p2852_p1), %s2586_s7, 512, %s2622_s3, %s999_s30, %s2021_s6, %s2021_s6, %s2022_s21  }
 0x334 PF: > { %s2853_s8 = sld [smem:[#allocation27_spill]]  ;;  %s2854_s25 = sld [smem:[#allocation31_spill]] }
 0x335   : > { %p2856_p10 = scmp.ge.s32.totalorder %s2010_s20, 2 }
 0x33a   : > { %s1075_s28 = sand.u32 1, %s2853_s8   ;;  %p2855_p8 = scmp.ne.s32.totalorder %s2854_s25, 0 }
 0x33b   : > { %s1076_s10 = scalar_lea.sflag [#allocation4], %s1075_s28 }
 0x33c   : > { %p1588_p5 = pnand %p2856_p10, %p2855_p8 }
 0x33e   : > { %1985 = dma.done.wait (!%p1588_p5), %s1076_s10, 512  }
 0x33f   : > { %1987 = vsyncadd (!%p1588_p5), %s1076_s10, 4294966784  ;;  %s2857_s17 = sadd.s32 4294967294, %s2010_s20  }
 0x340   : > { %s1084_s1 = sand.u32 1, %s2857_s17  }
 0x341   : > { %s1085_s29 = scalar_lea.sflag [#allocation15], %s1084_s1 }
 0x342   : > { %1989 = dma.done.wait (!%p1588_p5), %s1085_s29, 1024  }
 0x343   : > { %1991 = vsyncadd (!%p1588_p5), %s1085_s29, 4294966272  ;;  %s1103_s22 = scalar_lea.sflag [#allocation18], %s1075_s28 }
 0x344   : > { %1993 = dma.done.wait (!%p1588_p5), %s1103_s22, 512  }
 0x345   : > { %1995 = vsyncadd (!%p1588_p5), %s1103_s22, 4294966784  ;;  %s2858_s20 = sld [smem:[#allocation28_spill]]  ;;  %s2859_s3 = sld [smem:[#allocation29_spill]] }
 0x346   : > { %s2860_s17 = smov %s2002_s18  ;;  %s2861_s18 = smov %s2006_s19 }
 0x34b   : > { %p38_p1 = scmp.ge.s32.totalorder %s2858_s20, 4   ;;  %s2862_s19 = smov %s2859_s3 }
 0x34d   :  { %40 = sbr.rel (!%p38_p1) target bundleno = 27 (0x1b), region = 191 }
 0x354   :  { %1108 = vsyncpa [#allocation3], 1 }
 0x355   :  { %1110 = vsyncpa [#allocation3 + $0x1], 1 }
 0x356   :  { %1111 = vsyncpa [#allocation6], 1 }
 0x357   :  { %1113 = vsyncpa [#allocation6 + $0x1], 1 }
 0x358   :  { %1114 = vsyncpa [#allocation9], 1 }
 0x359   :  { %1116 = vsyncpa [#allocation9 + $0x1], 1 }
 0x35a   :  { %1117 = vsyncpa [#allocation12], 1 }
 0x35b   :  { %1118 = vsyncpa [#allocation4], 1 }
 0x35c   :  { %1120 = vsyncpa [#allocation4 + $0x1], 1 }
 0x35d   :  { %1121 = vsyncpa [#allocation15], 1 }
 0x35e   :  { %1123 = vsyncpa [#allocation15 + $0x1], 1 }
 0x35f   :  { %1124 = vsyncpa [#allocation18], 1 }
 0x360   :  { %1126 = vsyncpa [#allocation18 + $0x1], 1 }

</bundles_post_ra>
